<compile_context>
chip_gen: v6e
topology: v6e:2x2x1
jax: 0.10.0
libtpu: 0.0.40
codegen_flags: <defaults>
</compile_context>

<pallas_src>
import numpy as np
import jax
import jax.numpy as jnp
from jax.experimental import pallas as pl
from jax.experimental.pallas import tpu as pltpu

# ----------------------- static hyper-parameters -----------------------------
N_FFT = 512
WIN_LENGTH = 400
HOP = 160
F_MIN = 20.0
F_MAX = 7600.0
N_MELS = 80
SAMPLE_RATE = 16000
N_FREQS = N_FFT // 2 + 1            # 257 one-sided bins
N_MEL_PAD = 128                     # mel axis padded to one full lane tile
PREEMP_COEF = 0.97
TF_MAX = 1024                       # max frame tile (MXU M dim); ~9 MiB working set


def _round_up(x: int, m: int) -> int:
    return ((x + m - 1) // m) * m


def _cdiv(a: int, b: int) -> int:
    return -(-a // b)


# ----------------------- deterministic parameter setup -----------------------
def _padded_window() -> np.ndarray:
    # torch.hamming_window(win_length, periodic=True), centered inside n_fft (torch.stft)
    n = np.arange(WIN_LENGTH, dtype=np.float64)
    w = 0.54 - 0.46 * np.cos(2.0 * np.pi * n / WIN_LENGTH)
    left = (N_FFT - WIN_LENGTH) // 2
    right = N_FFT - WIN_LENGTH - left
    return np.pad(w, (left, right))                       # (n_fft,) float64


def _mel_filterbank_full() -> np.ndarray:
    # torchaudio.functional.melscale_fbanks, mel_scale='htk', norm=None. (257, 80) f64.
    def hz_to_mel(f):
        return 2595.0 * np.log10(1.0 + f / 700.0)

    def mel_to_hz(m):
        return 700.0 * (10.0 ** (m / 2595.0) - 1.0)

    all_freqs = np.linspace(0.0, SAMPLE_RATE / 2.0, N_FREQS)
    m_pts = np.linspace(hz_to_mel(F_MIN), hz_to_mel(F_MAX), N_MELS + 2)
    f_pts = mel_to_hz(m_pts)
    f_diff = f_pts[1:] - f_pts[:-1]                       # (n_mels + 1,)
    slopes = f_pts[None, :] - all_freqs[:, None]          # (n_freqs, n_mels + 2)
    down = -slopes[:, :-2] / f_diff[:-1]
    up = slopes[:, 2:] / f_diff[1:]
    return np.maximum(0.0, np.minimum(down, up))          # (n_freqs, n_mels)


_FB_FULL = _mel_filterbank_full()

# Derive the truncated/padded frequency axis from the filterbank itself: keep only
# bins that carry non-zero mel weight, rounded up to a 128-lane multiple.
_nz_bins = np.nonzero(np.any(_FB_FULL > 0.0, axis=1))[0]
_last_bin = int(_nz_bins[-1]) if _nz_bins.size else 0
N_FREQ_PAD = min(_round_up(_last_bin + 1, 128), _round_up(N_FREQS, 128))
# Guard: truncation must be exact (all dropped bins have zero mel weight).
assert np.all(_FB_FULL[N_FREQ_PAD:, :] == 0.0), "frequency truncation would drop energy"


def _fused_dft_matrix(n_freq_pad: int) -> np.ndarray:
    # Real-input one-sided DFT (truncated to n_freq_pad bins) as one matmul:
    #   cols [0, nfp)      -> window-folded cos terms (real part)
    #   cols [nfp, 2*nfp)  -> window-folded sin terms (imag part; sign irrelevant for power)
    # (frames * window) @ C  ==  frames @ (diag(window) @ C)
    w = _padded_window()
    nbins = min(n_freq_pad, N_FREQS)
    n = np.arange(N_FFT, dtype=np.float64)[:, None]
    f = np.arange(nbins, dtype=np.float64)[None, :]
    ang = 2.0 * np.pi * n * f / N_FFT
    cs = np.zeros((N_FFT, 2 * n_freq_pad), dtype=np.float64)
    cs[:, :nbins] = np.cos(ang)
    cs[:, n_freq_pad:n_freq_pad + nbins] = np.sin(ang)
    cs *= w[:, None]                                      # fold the Hamming window
    return cs.astype(np.float32)


def _mel_filterbank_padded(n_freq_pad: int) -> np.ndarray:
    fb_pad = np.zeros((n_freq_pad, N_MEL_PAD), dtype=np.float32)
    nbins = min(n_freq_pad, N_FREQS)
    fb_pad[:nbins, :N_MELS] = _FB_FULL[:nbins].astype(np.float32)
    return fb_pad


# bf16 fused DFT matrix (window folded in); bf16 mel filterbank (f32 accumulation in-kernel).
CS_MAT = jnp.asarray(_fused_dft_matrix(N_FREQ_PAD)).astype(jnp.bfloat16)   # (512, 512)
MEL_FB = jnp.asarray(_mel_filterbank_padded(N_FREQ_PAD)).astype(jnp.bfloat16)  # (256, 128)


# ------------------------------- kernel ---------------------------------------
def mel_kernel(frames_ref, cs_ref, fb_ref, out_ref):
    # frames_ref: (TF, n_fft)            bf16   (window folded into cs_ref)
    # cs_ref:     (n_fft, 2*n_freq_pad)  bf16   (cos | sin, window-folded)
    # fb_ref:     (n_freq_pad, 128)      bf16
    # out_ref:    (TF, 128)              f32
    y = jnp.dot(frames_ref[...], cs_ref[...],
                preferred_element_type=jnp.float32)              # (TF, 2*nfp) f32
    re = y[:, :N_FREQ_PAD]                                       # 128-aligned slices
    im = y[:, N_FREQ_PAD:]
    power = re * re + im * im                                    # power=2.0 (VPU)
    out_ref[...] = jnp.dot(power.astype(jnp.bfloat16), fb_ref[...],
                           preferred_element_type=jnp.float32)


# ------------------------------ wrapper ----------------------------------------
def mel_spectrogram(waveform: jax.Array, tile_frames_max: int = TF_MAX) -> jax.Array:
    """Equivalent of MelSpectrogramTorch.forward (defaults). (B, T) -> (B, frames, 80)."""
    assert waveform.ndim == 2, "The number of dimensions of input tensor must be 2!"
    waveform = waveform.astype(jnp.float32)
    B, T = waveform.shape

    # --- pre-emphasis: F.pad(x, (1,0), 'reflect') then conv1d([-0.97, 1.0]) ---
    # Plain jnp: XLA fuses this with the reflect pads / framing gather below.
    xpad = jnp.pad(waveform, ((0, 0), (1, 0)), mode="reflect")    # (B, T+1)
    preemp = xpad[:, 1:] - PREEMP_COEF * xpad[:, :-1]             # (B, T)

    # --- STFT framing (center=True, reflect pad n_fft//2 on both sides) ---
    xcenter = jnp.pad(preemp, ((0, 0), (N_FFT // 2, N_FFT // 2)), mode="reflect")
    # bf16 BEFORE the gather: halves the dominant HBM read of the 3.2x frame expansion
    # and feeds the bf16 MXU path directly (f32 accumulation in-kernel).
    xcenter = xcenter.astype(jnp.bfloat16)                        # (B, T + n_fft)
    n_frames = 1 + T // HOP                                       # torch.stft frame count
    idx = np.arange(n_frames)[:, None] * HOP + np.arange(N_FFT)[None, :]
    # TODO(synk): in-kernel framing (memory_space=pl.ANY + manual DMA of overlapping
    # chunks) would remove this 3.2x HBM-materialized expansion entirely (biggest
    # remaining cost on v6e); kept as an XLA gather for simplicity/robustness.
    frames = xcenter[:, idx]                                      # (B, n_frames, 512) bf16

    # --- flatten (B, n_frames) -> rows; pick frame tile after flattening ---
    total = B * n_frames
    frames = frames.reshape(total, N_FFT)
    n_steps = max(1, _cdiv(total, tile_frames_max))
    if n_steps == 1 and total >= 16:
        n_steps = 2                                # keep both v7x TensorCores busy
    TF = _round_up(_cdiv(total, n_steps), 8)       # sublane-aligned frame tile
    total_pad = n_steps * TF
    if total_pad > total:
        frames = jnp.pad(frames, ((0, total_pad - total), (0, 0)))

    out = pl.pallas_call(
        mel_kernel,
        out_shape=jax.ShapeDtypeStruct((total_pad, N_MEL_PAD), jnp.float32),
        grid=(n_steps,),
        in_specs=[
            pl.BlockSpec((TF, N_FFT), lambda i: (i, 0)),
            # Constant operands (index_map never moves); ~1.2 MiB total even with the
            # default double-buffering.
            pl.BlockSpec((N_FFT, 2 * N_FREQ_PAD), lambda i: (0, 0)),
            pl.BlockSpec((N_FREQ_PAD, N_MEL_PAD), lambda i: (0, 0)),
        ],
        out_specs=pl.BlockSpec((TF, N_MEL_PAD), lambda i: (i, 0)),
        compiler_params=pltpu.CompilerParams(
            dimension_semantics=("parallel",),
            vmem_limit_bytes=32 * 1024 * 1024),
    )(frames, CS_MAT, MEL_FB)

    # log=False and normalize=None by default -> nothing else to do.
    # Drop frame/mel padding; output is already (B, n_frames, n_mels) = x.permute(0,2,1).
    return out[:total, :N_MELS].reshape(B, n_frames, N_MELS)


# ------------------------------- demo -------------------------------------------
if __name__ == "__main__":
    key = jax.random.PRNGKey(0)
    B, T = 2, 1600                        # 0.1 s of 16 kHz audio -> 11 frames
    waveform = jax.random.normal(key, (B, T), dtype=jnp.float32)

    mel = mel_spectrogram(waveform)
    jax.block_until_ready(mel)

    expected_frames = 1 + T // HOP
    assert mel.shape == (B, expected_frames, N_MELS), mel.shape
    assert mel.dtype == jnp.float32
    assert bool(jnp.all(jnp.isfinite(mel)))
    print("KERNEL_OK")
</pallas_src>

<mosaic_0001>
module attributes {stable_mosaic.version = 11 : i64} {
  func.func @mel_kernel(%arg0: i32, %arg1: memref<16x512xbf16, #tpu.memory_space<vmem>>, %arg2: memref<512x512xbf16, #tpu.memory_space<vmem>>, %arg3: memref<256x128xbf16, #tpu.memory_space<vmem>>, %arg4: memref<16x128xf32, #tpu.memory_space<vmem>>) attributes {dimension_semantics = [#tpu.dimension_semantics<parallel>], iteration_bounds = array<i64: 2>, scalar_prefetch = 0 : i64, scratch_operands = 0 : i64, tpu.core_type = #tpu.core_type<tc>, window_params = [{transform_indices = @transform_0, window_bounds = array<i64: 16, 512>}, {pipeline_mode = #tpu.pipeline_mode<synchronous>, transform_indices = @transform_1, window_bounds = array<i64: 512, 512>}, {pipeline_mode = #tpu.pipeline_mode<synchronous>, transform_indices = @transform_2, window_bounds = array<i64: 256, 128>}, {transform_indices = @transform_3, window_bounds = array<i64: 16, 128>}]} {
    %c0 = arith.constant 0 : index
    %c0_0 = arith.constant 0 : index
    %0 = vector.load %arg1[%c0, %c0_0] : memref<16x512xbf16, #tpu.memory_space<vmem>>, vector<16x512xbf16>
    %c0_1 = arith.constant 0 : index
    %c0_2 = arith.constant 0 : index
    %1 = vector.load %arg2[%c0_1, %c0_2] : memref<512x512xbf16, #tpu.memory_space<vmem>>, vector<512x512xbf16>
    %cst = arith.constant dense<0.000000e+00> : vector<16x512xf32>
    %2 = tpu.matmul %0, %1, %cst {dimension_numbers = #tpu.dot_dimension_numbers<[1], [0], [0], [1], [0, 0, 1, 1], [], []>} : vector<16x512xbf16>, vector<512x512xbf16>, vector<16x512xf32> -> vector<16x512xf32>
    %3 = vector.extract_strided_slice %2 {offsets = [0, 0], sizes = [16, 256], strides = [1, 1]} : vector<16x512xf32> to vector<16x256xf32>
    %4 = vector.extract_strided_slice %2 {offsets = [0, 256], sizes = [16, 256], strides = [1, 1]} : vector<16x512xf32> to vector<16x256xf32>
    %5 = arith.mulf %3, %3 : vector<16x256xf32>
    %6 = arith.mulf %4, %4 : vector<16x256xf32>
    %7 = arith.addf %5, %6 : vector<16x256xf32>
    %8 = arith.truncf %7 : vector<16x256xf32> to vector<16x256xbf16>
    %c0_3 = arith.constant 0 : index
    %c0_4 = arith.constant 0 : index
    %9 = vector.load %arg3[%c0_3, %c0_4] : memref<256x128xbf16, #tpu.memory_space<vmem>>, vector<256x128xbf16>
    %cst_5 = arith.constant dense<0.000000e+00> : vector<16x128xf32>
    %10 = tpu.matmul %8, %9, %cst_5 {dimension_numbers = #tpu.dot_dimension_numbers<[1], [0], [0], [1], [0, 0, 1, 1], [], []>} : vector<16x256xbf16>, vector<256x128xbf16>, vector<16x128xf32> -> vector<16x128xf32>
    %c0_6 = arith.constant 0 : index
    %c0_7 = arith.constant 0 : index
    %11 = vector.load %arg4[%c0_6, %c0_7] : memref<16x128xf32, #tpu.memory_space<vmem>>, vector<16x128xf32>
    tpu.vector_store %arg4[%c0_6, %c0_7], %10 {strides = array<i32>} : memref<16x128xf32, #tpu.memory_space<vmem>>, vector<16x128xf32>,
    return
  }
  func.func @transform_0(%arg0: i32) -> (i32, i32) {
    %c0_i32 = arith.constant 0 : i32
    %c0_i32_0 = arith.constant 0 : i32
    return %arg0, %c0_i32 : i32, i32
  }
  func.func @transform_1(%arg0: i32) -> (i32, i32) {
    %c0_i32 = arith.constant 0 : i32
    %c0_i32_0 = arith.constant 0 : i32
    %c0_i32_1 = arith.constant 0 : i32
    return %c0_i32, %c0_i32_0 : i32, i32
  }
  func.func @transform_2(%arg0: i32) -> (i32, i32) {
    %c0_i32 = arith.constant 0 : i32
    %c0_i32_0 = arith.constant 0 : i32
    %c0_i32_1 = arith.constant 0 : i32
    return %c0_i32, %c0_i32_0 : i32, i32
  }
  func.func @transform_3(%arg0: i32) -> (i32, i32) {
    %c0_i32 = arith.constant 0 : i32
    %c0_i32_0 = arith.constant 0 : i32
    return %arg0, %c0_i32 : i32, i32
  }
}

</mosaic_0001>

<bundles_post_ra>
// kernel: tpu_custom_call.1
= control target key start
LH: loop header
LB: loop body
LE: loop exit
PB: predicated region body
PF: predicated region fallthrough
CT: control target
= control target key end

     0   :  { %8 = vsyncpa [#allocation3], 0  ;;  %s2345_s0 = inlined_call_operand.hbm [shape: bf16[32,512], index: 0, kind: input, shape index: {}]   ;;  %s2346_s1 = inlined_call_operand.hbm [shape: bf16[512,512], index: 1, kind: input, shape index: {}]   ;;  %s2347_s2 = inlined_call_operand.hbm [shape: bf16[256,128], index: 2, kind: input, shape index: {}]   ;;  %s2348_s3 = inlined_call_operand.hbm [shape: f32[32,128], index: 3, kind: output, shape index: {}]  }
   0x1   :  { %10 = vsyncpa [#allocation3 + $0x1], 0 }
   0x2   :  { %11 = vsyncpa [#allocation6], 0 }
   0x3   :  { %12 = vsyncpa [#allocation4], 0 }
   0x4   :  { %14 = vsyncpa [#allocation4 + $0x1], 0  ;;  %s2136_s12 = smov 0   ;;  %s2138_s13 = smov 0  }
   0x5   :  { %s2140_s14 = smov 0   ;;  %s2142_s15 = smov 0  }
   0x6 LB: > { %s2157_s16 = sadd.s32 4294967295, %s2104_s15   ;;  %s1477_s17 = sadd.s32 4294967294, %s2104_s15   ;;  %s2104_s15 = sphi %s2142_s15, %s2369_s15   ;;  %s2100_s14 = sphi %s2140_s14, %s2368_s14   ;;  %s2096_s13 = sphi %s2138_s13, %s2367_s13   ;;  %s2092_s12 = sphi %s2136_s12, %s2366_s12  }
   0x7   : > { %p40_p0 = scmp.ne.s32.totalorder %s2096_s13, %s2092_s12  ;;  %p2349_p1 = scmp.eq.s32.totalorder %s2157_s16, 0 }
   0x8   : > { %p106_p2 = scmp.eq.s32.totalorder %s2157_s16, 1  ;;  %p112_p3 = scmp.eq.s32.totalorder %s1477_s17, 1 }
   0x9   : > { %p2166_p4 = por %p2349_p1, %p40_p0  ;;  %p1478_p5 = scmp.ge.s32.totalorder %s2104_s15, 1 }
   0xa   : > { %p2171_p6 = por %p112_p3, %p40_p0  ;;  %p119_p7 = scmp.lt.s32.totalorder %s2104_s15, 3 }
   0xb   : > { %s2353_s18 = scalar_select %p2166_p4, 1, 0 }
   0xc   : > { %s2354_s19 = scalar_select %p2171_p6, 1, 0 }
   0xd   : > { %p2176_p8 = pnand %p1478_p5, %p119_p7  ;;  %s2106_s21 = smov [#allocation5]  }
   0xe   : > { %s131_s22 = sshll.u32 %s2106_s21, 4  ;;  %s2107_s24 = smov [#allocation7]   ;;  %s132_s22 = int_to_ptr.vmem [resolvable:$true] %s131_s22 }
   0xf   : > { %s2355_s20 = scalar_select %p2176_p8, 1, 0 }
  0x10   : > { %p1681_p9 = pneg %p2176_p8  ;;  %s144_s25 = sshll.u32 %s2107_s24, 4  ;;  %s145_s25 = int_to_ptr.vmem [resolvable:$true] %s144_s25 }
  0x11   : > { %s1967_s26 = scalar_lea.vmem %s132_s22, 16384  ;;  %p1975_p5 = scmp.lt.s32.totalorder %s132_s22, %s132_s22 }
  0x12   : > { %p2185_p11 = pnand %p1681_p9, %p2349_p1  ;;  %p1968_p13 = scmp.ne.s32.totalorder %s132_s22, %s1967_s26 }
  0x13   : > { %p1976_p7 = scmp.lt.s32.totalorder %s1967_s26, %s1967_s26 }
  0x14   : > { %p1958_p12 = pneg %p2185_p11 }
  0x15   : > { %p1977_p10 = por %p1976_p7, %p1975_p5 }
  0x16   : > { %p1970_p0 = pnand %p1968_p13, %p1958_p12 }
  0x18   : > { %p1971_p3 = pneg %p1970_p0 }
  0x1a   : > { %p1978_p9 = pnand %p1977_p10, %p1971_p3 }
  0x1c   : > { %1981 = shalt.err (!%p1978_p9)
}
  0x1d   : > { %s2108_s27 = smov 256   ;;  %s2109_s28 = smov 16  }
  0x1e   : > { %1684 = dma.hbm_to_vmem [thread:$0]  (!%p2185_p11), %s2346_s1, 16384, %s132_s22, [#allocation6], %s2108_s27, %s2108_s27, %s2109_s28  }
  0x1f   : > { %s1993_s4 = scalar_lea.vmem %s145_s25, 2048  ;;  %p2001_p10 = scmp.lt.s32.totalorder %s145_s25, %s145_s25 }
  0x20   : > { %p1994_p13 = scmp.ne.s32.totalorder %s145_s25, %s1993_s4  ;;  %p2002_p3 = scmp.lt.s32.totalorder %s1993_s4, %s1993_s4 }
  0x22   : > { %p1996_p0 = pnand %p1994_p13, %p1958_p12  ;;  %p2003_p7 = por %p2002_p3, %p2001_p10 }
  0x24   : > { %p1997_p5 = pneg %p1996_p0 }
  0x26   : > { %p2004_p9 = pnand %p2003_p7, %p1997_p5 }
  0x28   : > { %2007 = shalt.err (!%p2004_p9)
}
  0x29   : > { %s2110_s5 = smov 64   ;;  %s2111_s6 = smov 4  }
  0x2a   : > { %1687 = dma.hbm_to_vmem [thread:$0]  (!%p2185_p11), %s2347_s2, 2048, %s145_s25, [#allocation6], %s2110_s5, %s2110_s5, %s2111_s6  }
  0x2b   : > { %s2211_s9 = sadd.s32 1, %s2104_s15   ;;  %s27_s11 = sadd.s32 1, %s2100_s14 }
  0x2c   : > { %s24_s10 = ssub.s32 %s2104_s15, %s2211_s9  ;;  %p34_p13 = scmp.ne.s32.totalorder %s2100_s14, %s2096_s13 }
  0x2d   : > { %p25_p12 = scmp.eq.s32.totalorder %s24_s10, 0  ;;  %p35_p0 = scmp.eq.s32.totalorder %s2104_s15, 0 }
  0x2e   : > { %p2224_p10 = por %p106_p2, %p34_p13  ;;  %p1698_p3 = scmp.lt.s32.totalorder %s2104_s15, 2 }
  0x2f   : > { %s2220_s17 = scalar_select %p25_p12, %s2100_s14, %s27_s11  }
  0x30   : > { %p36_p5 = por %p35_p0, %p34_p13  ;;  %s158_s22 = sand.u32 1, %s2100_s14  }
  0x31   : > { %s2357_s21 = scalar_select %p2224_p10, 1, 0 }
  0x32   : > { %s1482_s23 = sshll.u32 %s158_s22, 5  ;;  %s1645_s24 = sshll.u32 %s2104_s15, 9 }
  0x33   : > { %s2234_s29 = scalar_lea.hbm %s2345_s0, %s1645_s24  ;;  %s162_s30 = scalar_lea.vmem [#allocation2], %s1482_s23 }
  0x34   : > { %s170_s4 = sshll.u32 %s162_s30, 4  ;;  %p2238_p2 = pnand %p1698_p3, %p36_p5  ;;  %s2236_s4 = int_to_ptr.vmem [resolvable:$true] %s170_s4 }
  0x35   : > { %s2242_s6 = scalar_lea.sflag [#allocation3], %s158_s22  ;;  %s2008_s7 = scalar_lea.hbm %s2234_s29, 512 }
  0x36   : > { %p2009_p11 = scmp.ne.s32.totalorder %s2234_s29, %s2008_s7  ;;  %p2010_p7 = pneg %p2238_p2 }
  0x37   : > { %s2013_s11 = scalar_lea.hbm %s2345_s0, 1024  ;;  %p2014_p13 = scmp.lt.s32.totalorder %s2234_s29, %s2345_s0 }
  0x38   : > { %p2011_p9 = pnand %p2010_p7, %p2009_p11  ;;  %p2015_p0 = scmp.lt.s32.totalorder %s2013_s11, %s2008_s7 }
  0x3a   : > { %p2012_p12 = pneg %p2011_p9  ;;  %p2016_p5 = por %p2015_p0, %p2014_p13 }
  0x3c   : > { %p2017_p3 = pnand %p2016_p5, %p2012_p12 }
  0x3e   : > { %2020 = shalt.err (!%p2017_p3)
}
  0x3f   : > { %s2021_s22 = scalar_lea.vmem %s2236_s4, 512  ;;  %s2112_s25 = smov [#allocation2]  }
  0x40   : > { %p2022_p1 = scmp.ne.s32.totalorder %s2236_s4, %s2021_s22  ;;  %s2026_s26 = sshll.u32 %s2112_s25, 4  ;;  %s2027_s26 = int_to_ptr.vmem [resolvable:$false] %s2026_s26 }
  0x41   : > { %s2028_s30 = scalar_lea.vmem %s2027_s26, 1024  ;;  %p2029_p9 = scmp.lt.s32.totalorder %s2236_s4, %s2027_s26 }
  0x42   : > { %p2024_p6 = pnand %p2022_p1, %p2010_p7  ;;  %p2030_p10 = scmp.lt.s32.totalorder %s2028_s30, %s2021_s22 }
  0x44   : > { %p2025_p11 = pneg %p2024_p6  ;;  %p2031_p4 = por %p2030_p10, %p2029_p9 }
  0x46   : > { %p2032_p8 = pnand %p2031_p4, %p2025_p11 }
  0x48   : > { %2035 = shalt.err (!%p2032_p8)
}
  0x49   : > { %1691 = dma.hbm_to_vmem [thread:$0]  (!%p2238_p2), %s2234_s29, 512, %s2236_s4, %s2242_s6, %s2108_s27, %s2108_s27, %s2109_s28  }
  0x4a   : > { %p2359_p1 = scmp.ne.s32.totalorder %s2355_s20, 0 }
  0x4b   : > { %s2269_s7 = sand.u32 (!%p2359_p1), 1, %s2096_s13   ;;  %p2360_p4 = scmp.ne.s32.totalorder (!%p2359_p1), %s2353_s18, 0 }
  0x4c   : > { %182 = sbr.rel (%p2359_p1) target bundleno = 638 (0x27e), region = 32  ;;  %s1487_s8 = sshll.u32 (!%p2359_p1), %s2269_s7, 5 }
  0x4d   : > { %s185_s10 = scalar_lea.sflag (!%p2359_p1), [#allocation3], %s2269_s7  ;;  %s2273_s11 = scalar_lea.vmem (!%p2359_p1), [#allocation2], %s1487_s8 }
  0x51   : > { %2079 = dma.done.wait (%p2360_p4), %s185_s10, 512  }
  0x52   : > { %2081 = vsyncadd (%p2360_p4), %s185_s10, 4294966784  ;;  %p2361_p6 = scmp.eq.s32.totalorder %s2157_s16, 0 }
  0x54   : > { %2083 = dma.done.wait (%p2361_p6), [#allocation6], 18432   ;;  %p2362_p8 = pmov %p2361_p6 }
  0x55   : > { %v1742_v0 = vld [vmem:[#allocation5 + $0xe4] ss:$16 sps:$4 sm:$0xff]   ;;  %v1746_v2 = vld [vmem:[#allocation5 + $0xe0] ss:$16 sps:$4 sm:$0xff]   ;;  %v1843_v51 = vld [vmem:[%s2273_s11 + $0xc] ss:$16 sps:$4 sm:$0xff]  }
  0x56   : > { %2085 = vsyncadd (%p2362_p8), [#allocation6], 4294948864  ;;  %v1744_v1 = vld [vmem:[#allocation5 + $0x2e4] ss:$16 sps:$4 sm:$0xff]   ;;  %1014 = vmatprep.subr.bf16.mxu0 %v1742_v0  ;;  %v1747_v3 = vld [vmem:[#allocation5 + $0x2e0] ss:$16 sps:$4 sm:$0xff]   ;;  %1089 = vmatprep.mubr.bf16.mxu1 %v1843_v51 }
  0x57   : > { %1057 = vmatprep.subr.bf16.mxu1 %v1744_v1  ;;  %v1748_v4 = vld [vmem:[#allocation5 + $0xc4] ss:$16 sps:$4 sm:$0xff]   ;;  %1015 = vmatpush1.bf16.msra.mxu0 %v1746_v2  ;;  %v1752_v6 = vld [vmem:[#allocation5 + $0xc0] ss:$16 sps:$4 sm:$0xff]   ;;  %v1846_v2 = vld [vmem:[#allocation5 + $0xec] ss:$16 sps:$4 sm:$0xff]  }
  0x58   : > { %1058 = vmatpush1.bf16.msra.mxu1 %v1747_v3  ;;  %v1750_v5 = vld [vmem:[#allocation5 + $0x2c4] ss:$16 sps:$4 sm:$0xff]   ;;  %1016 = vmatprep.subr.bf16.mxu0 %v1748_v4  ;;  %v1753_v7 = vld [vmem:[#allocation5 + $0x2c0] ss:$16 sps:$4 sm:$0xff]   ;;  %v1849_v3 = vld [vmem:[#allocation5 + $0x2ec] ss:$16 sps:$4 sm:$0xff]  }
  0x59   : > { %1059 = vmatprep.subr.bf16.mxu1 %v1750_v5  ;;  %v1754_v8 = vld [vmem:[#allocation5 + $0xa4] ss:$16 sps:$4 sm:$0xff]   ;;  %v1758_v10 = vld [vmem:[#allocation5 + $0xa0] ss:$16 sps:$4 sm:$0xff]   ;;  %v2289_v5 = vld [vmem:[%s2273_s11 + $0x8] ss:$16 sps:$4 sm:$0xff]  }
  0x5a   : > { %v1756_v9 = vld [vmem:[#allocation5 + $0x2a4] ss:$16 sps:$4 sm:$0xff]   ;;  %v1759_v11 = vld [vmem:[#allocation5 + $0x2a0] ss:$16 sps:$4 sm:$0xff]   ;;  %s1490_s18 = sshll.u32 %s2269_s7, 4  ;;  %s1646_s28 = sshll.u32 %s2157_s16, 8 }
  0x5b   : > { %1017 = vmatpush1.bf16.msra.mxu0 %v1752_v6  ;;  %v1760_v12 = vld [vmem:[#allocation5 + $0x84] ss:$16 sps:$4 sm:$0xff]   ;;  %v1764_v14 = vld [vmem:[#allocation5 + $0x80] ss:$16 sps:$4 sm:$0xff]   ;;  %v1844_v6 = vld [vmem:[#allocation5 + $0xe8] ss:$16 sps:$4 sm:$0xff]   ;;  %s2302_s5 = scalar_lea.hbm %s2348_s3, %s1646_s28 }
  0x5c   : > { %1060 = vmatpush1.bf16.msra.mxu1 %v1753_v7  ;;  %1018 = vmatprep.subr.bf16.mxu0 %v1754_v8  ;;  %v1762_v13 = vld [vmem:[#allocation5 + $0x284] ss:$16 sps:$4 sm:$0xff]   ;;  %v1765_v15 = vld [vmem:[#allocation5 + $0x280] ss:$16 sps:$4 sm:$0xff]   ;;  %v1847_v7 = vld [vmem:[#allocation5 + $0x2e8] ss:$16 sps:$4 sm:$0xff]  }
  0x5d   : > { %1061 = vmatprep.subr.bf16.mxu1 %v1756_v9  ;;  %v1766_v16 = vld [vmem:[#allocation5 + $0x64] ss:$16 sps:$4 sm:$0xff]   ;;  %v1770_v18 = vld [vmem:[#allocation5 + $0x60] ss:$16 sps:$4 sm:$0xff]   ;;  %v1852_v8 = vld [vmem:[#allocation5 + $0xcc] ss:$16 sps:$4 sm:$0xff]  }
  0x5e   : > { %v1768_v17 = vld [vmem:[#allocation5 + $0x264] ss:$16 sps:$4 sm:$0xff]   ;;  %v1771_v19 = vld [vmem:[#allocation5 + $0x260] ss:$16 sps:$4 sm:$0xff]   ;;  %v1855_v9 = vld [vmem:[#allocation5 + $0x2cc] ss:$16 sps:$4 sm:$0xff]  }
  0x5f   : > { %1019 = vmatpush1.bf16.msra.mxu0 %v1758_v10  ;;  %v1772_v20 = vld [vmem:[#allocation5 + $0x44] ss:$16 sps:$4 sm:$0xff]   ;;  %v1776_v22 = vld [vmem:[#allocation5 + $0x40] ss:$16 sps:$4 sm:$0xff]   ;;  %v1850_v10 = vld [vmem:[#allocation5 + $0xc8] ss:$16 sps:$4 sm:$0xff]  }
  0x60   : > { %1062 = vmatpush1.bf16.msra.mxu1 %v1759_v11  ;;  %1020 = vmatprep.subr.bf16.mxu0 %v1760_v12  ;;  %v1774_v21 = vld [vmem:[#allocation5 + $0x244] ss:$16 sps:$4 sm:$0xff]   ;;  %v1777_v23 = vld [vmem:[#allocation5 + $0x240] ss:$16 sps:$4 sm:$0xff]   ;;  %v1853_v11 = vld [vmem:[#allocation5 + $0x2c8] ss:$16 sps:$4 sm:$0xff]  }
  0x61   : > { %1063 = vmatprep.subr.bf16.mxu1 %v1762_v13  ;;  %v1778_v24 = vld [vmem:[#allocation5 + $0x24] ss:$16 sps:$4 sm:$0xff]   ;;  %v1782_v26 = vld [vmem:[#allocation5 + $0x20] ss:$16 sps:$4 sm:$0xff]   ;;  %v1858_v12 = vld [vmem:[#allocation5 + $0xac] ss:$16 sps:$4 sm:$0xff]  }
  0x62   : > { %v1780_v25 = vld [vmem:[#allocation5 + $0x224] ss:$16 sps:$4 sm:$0xff]   ;;  %v1783_v27 = vld [vmem:[#allocation5 + $0x220] ss:$16 sps:$4 sm:$0xff]   ;;  %v1861_v13 = vld [vmem:[#allocation5 + $0x2ac] ss:$16 sps:$4 sm:$0xff]  }
  0x63   : > { %1021 = vmatpush1.bf16.msra.mxu0 %v1764_v14  ;;  %v1784_v28 = vld [vmem:[#allocation5 + $0x4] ss:$16 sps:$4 sm:$0xff]   ;;  %v1788_v30 = vld [vmem:[#allocation5] ss:$16 sps:$4 sm:$0xff]   ;;  %v1856_v14 = vld [vmem:[#allocation5 + $0xa8] ss:$16 sps:$4 sm:$0xff]  }
  0x64   : > { %1064 = vmatpush1.bf16.msra.mxu1 %v1765_v15  ;;  %1022 = vmatprep.subr.bf16.mxu0 %v1766_v16  ;;  %v1786_v29 = vld [vmem:[#allocation5 + $0x204] ss:$16 sps:$4 sm:$0xff]   ;;  %v1789_v31 = vld [vmem:[#allocation5 + $0x200] ss:$16 sps:$4 sm:$0xff]   ;;  %v1859_v15 = vld [vmem:[#allocation5 + $0x2a8] ss:$16 sps:$4 sm:$0xff]  }
  0x65   : > { %1065 = vmatprep.subr.bf16.mxu1 %v1768_v17  ;;  %v1790_v32 = vld [vmem:[#allocation5 + $0x1e4] ss:$16 sps:$4 sm:$0xff]   ;;  %v1794_v34 = vld [vmem:[#allocation5 + $0x1e0] ss:$16 sps:$4 sm:$0xff]   ;;  %v1864_v16 = vld [vmem:[#allocation5 + $0x8c] ss:$16 sps:$4 sm:$0xff]  }
  0x66   : > { %v1792_v33 = vld [vmem:[#allocation5 + $0x3e4] ss:$16 sps:$4 sm:$0xff]   ;;  %v1795_v35 = vld [vmem:[#allocation5 + $0x3e0] ss:$16 sps:$4 sm:$0xff]   ;;  %v1867_v17 = vld [vmem:[#allocation5 + $0x28c] ss:$16 sps:$4 sm:$0xff]  }
  0x67   : > { %1023 = vmatpush1.bf16.msra.mxu0 %v1770_v18  ;;  %v1796_v36 = vld [vmem:[#allocation5 + $0x1c4] ss:$16 sps:$4 sm:$0xff]   ;;  %v1800_v38 = vld [vmem:[#allocation5 + $0x1c0] ss:$16 sps:$4 sm:$0xff]   ;;  %v1862_v18 = vld [vmem:[#allocation5 + $0x88] ss:$16 sps:$4 sm:$0xff]  }
  0x68   : > { %1066 = vmatpush1.bf16.msra.mxu1 %v1771_v19  ;;  %1024 = vmatprep.subr.bf16.mxu0 %v1772_v20  ;;  %v1798_v37 = vld [vmem:[#allocation5 + $0x3c4] ss:$16 sps:$4 sm:$0xff]   ;;  %v1801_v39 = vld [vmem:[#allocation5 + $0x3c0] ss:$16 sps:$4 sm:$0xff]   ;;  %v1865_v19 = vld [vmem:[#allocation5 + $0x288] ss:$16 sps:$4 sm:$0xff]  }
  0x69   : > { %1067 = vmatprep.subr.bf16.mxu1 %v1774_v21  ;;  %v1802_v40 = vld [vmem:[#allocation5 + $0x1a4] ss:$16 sps:$4 sm:$0xff]   ;;  %v1806_v42 = vld [vmem:[#allocation5 + $0x1a0] ss:$16 sps:$4 sm:$0xff]   ;;  %v1870_v20 = vld [vmem:[#allocation5 + $0x6c] ss:$16 sps:$4 sm:$0xff]  }
  0x6a   : > { %v1804_v41 = vld [vmem:[#allocation5 + $0x3a4] ss:$16 sps:$4 sm:$0xff]   ;;  %v1807_v43 = vld [vmem:[#allocation5 + $0x3a0] ss:$16 sps:$4 sm:$0xff]   ;;  %v1873_v21 = vld [vmem:[#allocation5 + $0x26c] ss:$16 sps:$4 sm:$0xff]  }
  0x6b   : > { %1025 = vmatpush1.bf16.msra.mxu0 %v1776_v22  ;;  %v1808_v44 = vld [vmem:[#allocation5 + $0x184] ss:$16 sps:$4 sm:$0xff]   ;;  %v1812_v46 = vld [vmem:[#allocation5 + $0x180] ss:$16 sps:$4 sm:$0xff]   ;;  %v1868_v22 = vld [vmem:[#allocation5 + $0x68] ss:$16 sps:$4 sm:$0xff]  }
  0x6c   : > { %1068 = vmatpush1.bf16.msra.mxu1 %v1777_v23  ;;  %1026 = vmatprep.subr.bf16.mxu0 %v1778_v24  ;;  %v1810_v45 = vld [vmem:[#allocation5 + $0x384] ss:$16 sps:$4 sm:$0xff]   ;;  %v1813_v47 = vld [vmem:[#allocation5 + $0x380] ss:$16 sps:$4 sm:$0xff]   ;;  %v1871_v23 = vld [vmem:[#allocation5 + $0x268] ss:$16 sps:$4 sm:$0xff]  }
  0x6d   : > { %1069 = vmatprep.subr.bf16.mxu1 %v1780_v25  ;;  %v1814_v48 = vld [vmem:[#allocation5 + $0x164] ss:$16 sps:$4 sm:$0xff]   ;;  %v1818_v52 = vld [vmem:[#allocation5 + $0x160] ss:$16 sps:$4 sm:$0xff]   ;;  %v1876_v24 = vld [vmem:[#allocation5 + $0x4c] ss:$16 sps:$4 sm:$0xff]  }
  0x6e   : > { %v1840_v49 = vld [vmem:[%s2273_s11 + $0x4] ss:$16 sps:$4 sm:$0xff]   ;;  %v1819_v53 = vld [vmem:[#allocation5 + $0x360] ss:$16 sps:$4 sm:$0xff]   ;;  %v1879_v25 = vld [vmem:[#allocation5 + $0x24c] ss:$16 sps:$4 sm:$0xff]  }
  0x6f   : > { %1027 = vmatpush1.bf16.msra.mxu0 %v1782_v26  ;;  %v1816_v50 = vld [vmem:[#allocation5 + $0x364] ss:$16 sps:$4 sm:$0xff]   ;;  %1046 = vmatprep.mubr.bf16.mxu0 %v1840_v49  ;;  %v1824_v56 = vld [vmem:[#allocation5 + $0x140] ss:$16 sps:$4 sm:$0xff]   ;;  %v1874_v26 = vld [vmem:[#allocation5 + $0x48] ss:$16 sps:$4 sm:$0xff]  }
  0x70   : > { %1070 = vmatpush1.bf16.msra.mxu1 %v1783_v27  ;;  %1028 = vmatprep.subr.bf16.mxu0 %v1784_v28  ;;  %v1820_v54 = vld [vmem:[#allocation5 + $0x144] ss:$16 sps:$4 sm:$0xff]   ;;  %v1825_v57 = vld [vmem:[#allocation5 + $0x340] ss:$16 sps:$4 sm:$0xff]   ;;  %v1877_v27 = vld [vmem:[#allocation5 + $0x248] ss:$16 sps:$4 sm:$0xff]  }
  0x71   : > { %1071 = vmatprep.subr.bf16.mxu1 %v1786_v29  ;;  %v1822_v55 = vld [vmem:[#allocation5 + $0x344] ss:$16 sps:$4 sm:$0xff]   ;;  %v1830_v60 = vld [vmem:[#allocation5 + $0x120] ss:$16 sps:$4 sm:$0xff]   ;;  %v1882_v28 = vld [vmem:[#allocation5 + $0x2c] ss:$16 sps:$4 sm:$0xff]  }
  0x72   : > { %v1826_v58 = vld [vmem:[#allocation5 + $0x124] ss:$16 sps:$4 sm:$0xff]   ;;  %v1831_v61 = vld [vmem:[#allocation5 + $0x320] ss:$16 sps:$4 sm:$0xff]   ;;  %v1885_v29 = vld [vmem:[#allocation5 + $0x22c] ss:$16 sps:$4 sm:$0xff]  }
  0x73   : > { %1029 = vmatpush1.bf16.msra.mxu0 %v1788_v30  ;;  %v1828_v59 = vld [vmem:[#allocation5 + $0x324] ss:$16 sps:$4 sm:$0xff]   ;;  %v1836_v0 = vld [vmem:[#allocation5 + $0x100] ss:$16 sps:$4 sm:$0xff]   ;;  %v1880_v30 = vld [vmem:[#allocation5 + $0x28] ss:$16 sps:$4 sm:$0xff]  }
  0x74   : > { %1072 = vmatpush1.bf16.msra.mxu1 %v1789_v31  ;;  %1030 = vmatprep.subr.bf16.mxu0 %v1790_v32  ;;  %v1832_v62 = vld [vmem:[#allocation5 + $0x104] ss:$16 sps:$4 sm:$0xff]   ;;  %v1837_v1 = vld [vmem:[#allocation5 + $0x300] ss:$16 sps:$4 sm:$0xff]   ;;  %v1883_v31 = vld [vmem:[#allocation5 + $0x228] ss:$16 sps:$4 sm:$0xff]  }
  0x75   : > { %1073 = vmatprep.subr.bf16.mxu1 %v1792_v33  ;;  %v1834_v63 = vld [vmem:[#allocation5 + $0x304] ss:$16 sps:$4 sm:$0xff]   ;;  %v2286_v4 = vld [vmem:[%s2273_s11] ss:$16 sps:$4 sm:$0xff]   ;;  %v1888_v32 = vld [vmem:[#allocation5 + $0xc] ss:$16 sps:$4 sm:$0xff]  }
  0x76   : > { %v1891_v33 = vld [vmem:[#allocation5 + $0x20c] ss:$16 sps:$4 sm:$0xff]   ;;  %s218_s20 = scalar_lea.vmem [#allocation8], %s1490_s18  ;;  %s1372_s6 = scalar_lea.sflag [#allocation4], %s2269_s7 }
  0x77   : > { %1031 = vmatpush2.bf16.msra.mxu0 %v1794_v34  ;;  %v1886_v34 = vld [vmem:[#allocation5 + $0x8] ss:$16 sps:$4 sm:$0xff]   ;;  %s1385_s27 = sshll.u32 %s218_s20, 4  ;;  %p2363_p2 = scmp.ne.s32.totalorder %s2357_s21, 0  ;;  %s2297_s27 = int_to_ptr.vmem [resolvable:$true] %s1385_s27 }
  0x78   : > { %1074 = vmatpush2.bf16.msra.mxu1 %v1795_v35  ;;  %1032 = vmatprep.subr.bf16.mxu0 %v1796_v36  ;;  %v1889_v35 = vld [vmem:[#allocation5 + $0x208] ss:$16 sps:$4 sm:$0xff]   ;;  %v1894_v36 = vld [vmem:[#allocation5 + $0x1ec] ss:$16 sps:$4 sm:$0xff]   ;;  %s2036_s23 = scalar_lea.vmem %s2297_s27, 256  ;;  %s2113_s16 = smov [#allocation8]  }
  0x79   : > { %1075 = vmatprep.subr.bf16.mxu1 %v1798_v37  ;;  %v1897_v37 = vld [vmem:[#allocation5 + $0x3ec] ss:$16 sps:$4 sm:$0xff]   ;;  %p2037_p10 = scmp.ne.s32.totalorder %s2297_s27, %s2036_s23  ;;  %s2040_s24 = sshll.u32 %s2113_s16, 4  ;;  %s2041_s24 = int_to_ptr.vmem [resolvable:$false] %s2040_s24 }
  0x7a   : > { %s2042_s22 = scalar_lea.vmem %s2041_s24, 512  ;;  %p2043_p13 = scmp.lt.s32.totalorder %s2297_s27, %s2041_s24 }
  0x7b   : > { %1033 = vmatpush2.bf16.msra.mxu0 %v1800_v38  ;;  %v1892_v38 = vld [vmem:[#allocation5 + $0x1e8] ss:$16 sps:$4 sm:$0xff]   ;;  %p2038_p7 = pnand %p2037_p10, %p2363_p2  ;;  %p2044_p0 = scmp.lt.s32.totalorder %s2042_s22, %s2036_s23 }
  0x7c   : > { %1076 = vmatpush2.bf16.msra.mxu1 %v1801_v39  ;;  %1034 = vmatprep.subr.bf16.mxu0 %v1802_v40  ;;  %v1895_v39 = vld [vmem:[#allocation5 + $0x3e8] ss:$16 sps:$4 sm:$0xff]   ;;  %v1900_v40 = vld [vmem:[#allocation5 + $0x1cc] ss:$16 sps:$4 sm:$0xff]  }
  0x7d   : > { %1077 = vmatprep.subr.bf16.mxu1 %v1804_v41  ;;  %v1903_v41 = vld [vmem:[#allocation5 + $0x3cc] ss:$16 sps:$4 sm:$0xff]   ;;  %p2039_p12 = pneg %p2038_p7  ;;  %p2045_p5 = por %p2044_p0, %p2043_p13 }
  0x7f   : > { %1035 = vmatpush2.bf16.msra.mxu0 %v1806_v42  ;;  %v1898_v42 = vld [vmem:[#allocation5 + $0x1c8] ss:$16 sps:$4 sm:$0xff]   ;;  %p2046_p3 = pnand %p2045_p5, %p2039_p12 }
  0x80   : > { %1078 = vmatpush2.bf16.msra.mxu1 %v1807_v43  ;;  %1036 = vmatprep.subr.bf16.mxu0 %v1808_v44  ;;  %v1901_v43 = vld [vmem:[#allocation5 + $0x3c8] ss:$16 sps:$4 sm:$0xff]   ;;  %v1906_v44 = vld [vmem:[#allocation5 + $0x1ac] ss:$16 sps:$4 sm:$0xff]  }
  0x81   : > { %1079 = vmatprep.subr.bf16.mxu1 %v1810_v45  ;;  %v1909_v45 = vld [vmem:[#allocation5 + $0x3ac] ss:$16 sps:$4 sm:$0xff]  }
  0x83   : > { %1037 = vmatpush2.bf16.msra.mxu0 %v1812_v46  ;;  %v1904_v46 = vld [vmem:[#allocation5 + $0x1a8] ss:$16 sps:$4 sm:$0xff]  }
  0x84   : > { %1080 = vmatpush2.bf16.msra.mxu1 %v1813_v47  ;;  %1038 = vmatprep.subr.bf16.mxu0 %v1814_v48  ;;  %v1907_v47 = vld [vmem:[#allocation5 + $0x3a8] ss:$16 sps:$4 sm:$0xff]   ;;  %v1912_v48 = vld [vmem:[#allocation5 + $0x18c] ss:$16 sps:$4 sm:$0xff]  }
  0x85   : > { %1081 = vmatprep.subr.bf16.mxu1 %v1816_v50  ;;  %v1910_v50 = vld [vmem:[#allocation5 + $0x188] ss:$16 sps:$4 sm:$0xff]  }
  0x87   : > { %1039 = vmatpush2.bf16.msra.mxu0 %v1818_v52  ;;  %v1918_v52 = vld [vmem:[#allocation5 + $0x16c] ss:$16 sps:$4 sm:$0xff]  }
  0x88   : > { %1082 = vmatpush2.bf16.msra.mxu1 %v1819_v53  ;;  %1040 = vmatprep.subr.bf16.mxu0 %v1820_v54  ;;  %v1921_v53 = vld [vmem:[#allocation5 + $0x36c] ss:$16 sps:$4 sm:$0xff]   ;;  %v1916_v54 = vld [vmem:[#allocation5 + $0x168] ss:$16 sps:$4 sm:$0xff]  }
  0x89   : > { %1083 = vmatprep.subr.bf16.mxu1 %v1822_v55  ;;  %v1919_v55 = vld [vmem:[#allocation5 + $0x368] ss:$16 sps:$4 sm:$0xff]  }
  0x8b   : > { %1041 = vmatpush2.bf16.msra.mxu0 %v1824_v56  ;;  %v1924_v56 = vld [vmem:[#allocation5 + $0x14c] ss:$16 sps:$4 sm:$0xff]  }
  0x8c   : > { %1084 = vmatpush2.bf16.msra.mxu1 %v1825_v57  ;;  %1042 = vmatprep.subr.bf16.mxu0 %v1826_v58  ;;  %v1927_v57 = vld [vmem:[#allocation5 + $0x34c] ss:$16 sps:$4 sm:$0xff]   ;;  %v1922_v58 = vld [vmem:[#allocation5 + $0x148] ss:$16 sps:$4 sm:$0xff]  }
  0x8d   : > { %1085 = vmatprep.subr.bf16.mxu1 %v1828_v59  ;;  %v1925_v59 = vld [vmem:[#allocation5 + $0x348] ss:$16 sps:$4 sm:$0xff]  }
  0x8f   : > { %1043 = vmatpush2.bf16.msra.mxu0 %v1830_v60  ;;  %v1930_v60 = vld [vmem:[#allocation5 + $0x12c] ss:$16 sps:$4 sm:$0xff]  }
  0x90   : > { %1086 = vmatpush2.bf16.msra.mxu1 %v1831_v61  ;;  %1044 = vmatprep.subr.bf16.mxu0 %v1832_v62  ;;  %v1933_v61 = vld [vmem:[#allocation5 + $0x32c] ss:$16 sps:$4 sm:$0xff]   ;;  %v1928_v62 = vld [vmem:[#allocation5 + $0x128] ss:$16 sps:$4 sm:$0xff]  }
  0x91   : > { %1087 = vmatprep.subr.bf16.mxu1 %v1834_v63  ;;  %v1931_v63 = vld [vmem:[#allocation5 + $0x328] ss:$16 sps:$4 sm:$0xff]  }
  0x93   : > { %1045 = vmatpush2.bf16.msra.mxu0 %v1836_v0  ;;  %v1936_v0 = vld [vmem:[#allocation5 + $0x10c] ss:$16 sps:$4 sm:$0xff]  }
  0x94   : > { %1088 = vmatpush2.bf16.msra.mxu1 %v1837_v1  ;;  %1100 = vmatprep.subr.bf16.mxu0 %v1846_v2  ;;  %v1939_v1 = vld [vmem:[#allocation5 + $0x30c] ss:$16 sps:$4 sm:$0xff]   ;;  %v1934_v2 = vld [vmem:[#allocation5 + $0x108] ss:$16 sps:$4 sm:$0xff]  }
  0x95   : > { %1143 = vmatprep.subr.bf16.mxu1 %v1849_v3  ;;  %v1937_v3 = vld [vmem:[#allocation5 + $0x308] ss:$16 sps:$4 sm:$0xff]  }
  0x96   : > { %1047 = vmatmul.mubr.bf16.vlgmr.msra.gmra.mxu0 %v2286_v4 }
  0x97   : > { %1090 = vmatmul.mubr.bf16.vlgmr.msra.gmra.mxu1 %v2289_v5  ;;  %1101 = vmatpush1.bf16.msra.mxu0 %v1844_v6  ;;  %v1940_v6 = vld [vmem:[#allocation7 + $0x78] sm:$0xff]  }
  0x98   : > { %1144 = vmatpush1.bf16.msra.mxu1 %v1847_v7  ;;  %1102 = vmatprep.subr.bf16.mxu0 %v1852_v8  ;;  %v1941_v7 = vld [vmem:[#allocation7 + $0x38] sm:$0xff]   ;;  %v1942_v8 = vld [vmem:[#allocation7 + $0x70] sm:$0xff]  }
  0x99   : > { %1145 = vmatprep.subr.bf16.mxu1 %v1855_v9  ;;  %1132 = vmatprep.mubr.bf16.mxu0 %v1840_v49  ;;  %v1915_v49 = vld [vmem:[#allocation5 + $0x38c] ss:$16 sps:$4 sm:$0xff]   ;;  %v1943_v9 = vld [vmem:[#allocation7 + $0x30] sm:$0xff]  }
  0x9a   : > { %1175 = vmatprep.mubr.bf16.mxu1 %v1843_v51  ;;  %v1913_v51 = vld [vmem:[#allocation5 + $0x388] ss:$16 sps:$4 sm:$0xff]  }
  0x9b   : > { %1103 = vmatpush1.bf16.msra.mxu0 %v1850_v10  ;;  %v1944_v10 = vld [vmem:[#allocation7 + $0x68] sm:$0xff]  }
  0x9c   : > { %1146 = vmatpush1.bf16.msra.mxu1 %v1853_v11  ;;  %1104 = vmatprep.subr.bf16.mxu0 %v1858_v12  ;;  %v1945_v11 = vld [vmem:[#allocation7 + $0x28] sm:$0xff]   ;;  %v1946_v12 = vld [vmem:[#allocation7 + $0x60] sm:$0xff]  }
  0x9d   : > { %1147 = vmatprep.subr.bf16.mxu1 %v1861_v13  ;;  %v1947_v13 = vld [vmem:[#allocation7 + $0x20] sm:$0xff]  }
  0x9f   : > { %1105 = vmatpush1.bf16.msra.mxu0 %v1856_v14  ;;  %v1948_v14 = vld [vmem:[#allocation7 + $0x58] sm:$0xff]  }
  0xa0   : > { %1148 = vmatpush1.bf16.msra.mxu1 %v1859_v15  ;;  %1106 = vmatprep.subr.bf16.mxu0 %v1864_v16  ;;  %v1951_v15 = vld [vmem:[#allocation7 + $0x10] sm:$0xff]   ;;  %v1952_v16 = vld [vmem:[#allocation7 + $0x48] sm:$0xff]  }
  0xa1   : > { %1149 = vmatprep.subr.bf16.mxu1 %v1867_v17  ;;  %v1953_v17 = vld [vmem:[#allocation7 + $0x8] sm:$0xff]  }
  0xa3   : > { %1107 = vmatpush1.bf16.msra.mxu0 %v1862_v18  ;;  %v1954_v18 = vld [vmem:[#allocation7 + $0x40] sm:$0xff]  }
  0xa4   : > { %1150 = vmatpush1.bf16.msra.mxu1 %v1865_v19  ;;  %1108 = vmatprep.subr.bf16.mxu0 %v1870_v20  ;;  %v1955_v19 = vld [vmem:[#allocation7] sm:$0xff]  }
  0xa5   : > { %1151 = vmatprep.subr.bf16.mxu1 %v1873_v21 }
  0xa7   : > { %1109 = vmatpush1.bf16.msra.mxu0 %v1868_v22 }
  0xa8   : > { %1152 = vmatpush1.bf16.msra.mxu1 %v1871_v23  ;;  %1110 = vmatprep.subr.bf16.mxu0 %v1876_v24 }
  0xa9   : > { %1153 = vmatprep.subr.bf16.mxu1 %v1879_v25 }
  0xab   : > { %1111 = vmatpush1.bf16.msra.mxu0 %v1874_v26 }
  0xac   : > { %1154 = vmatpush1.bf16.msra.mxu1 %v1877_v27  ;;  %1112 = vmatprep.subr.bf16.mxu0 %v1882_v28 }
  0xad   : > { %1155 = vmatprep.subr.bf16.mxu1 %v1885_v29 }
  0xaf   : > { %1113 = vmatpush1.bf16.msra.mxu0 %v1880_v30 }
  0xb0   : > { %1156 = vmatpush1.bf16.msra.mxu1 %v1883_v31  ;;  %1114 = vmatprep.subr.bf16.mxu0 %v1888_v32 }
  0xb1   : > { %1157 = vmatprep.subr.bf16.mxu1 %v1891_v33 }
  0xb3   : > { %1115 = vmatpush1.bf16.msra.mxu0 %v1886_v34 }
  0xb4   : > { %1158 = vmatpush1.bf16.msra.mxu1 %v1889_v35  ;;  %1116 = vmatprep.subr.bf16.mxu0 %v1894_v36 }
  0xb5   : > { %1159 = vmatprep.subr.bf16.mxu1 %v1897_v37 }
  0xb7   : > { %1117 = vmatpush2.bf16.msra.mxu0 %v1892_v38 }
  0xb8   : > { %1160 = vmatpush2.bf16.msra.mxu1 %v1895_v39  ;;  %1118 = vmatprep.subr.bf16.mxu0 %v1900_v40 }
  0xb9   : > { %1161 = vmatprep.subr.bf16.mxu1 %v1903_v41 }
  0xbb   : > { %1119 = vmatpush2.bf16.msra.mxu0 %v1898_v42 }
  0xbc   : > { %1162 = vmatpush2.bf16.msra.mxu1 %v1901_v43  ;;  %1120 = vmatprep.subr.bf16.mxu0 %v1906_v44 }
  0xbd   : > { %1163 = vmatprep.subr.bf16.mxu1 %v1909_v45 }
  0xbf   : > { %1121 = vmatpush2.bf16.msra.mxu0 %v1904_v46 }
  0xc0   : > { %1164 = vmatpush2.bf16.msra.mxu1 %v1907_v47  ;;  %1122 = vmatprep.subr.bf16.mxu0 %v1912_v48 }
  0xc1   : > { %1165 = vmatprep.subr.bf16.mxu1 %v1915_v49 }
  0xc3   : > { %1123 = vmatpush2.bf16.msra.mxu0 %v1910_v50 }
  0xc4   : > { %1166 = vmatpush2.bf16.msra.mxu1 %v1913_v51  ;;  %1124 = vmatprep.subr.bf16.mxu0 %v1918_v52 }
  0xc5   : > { %1167 = vmatprep.subr.bf16.mxu1 %v1921_v53 }
  0xc7   : > { %1125 = vmatpush2.bf16.msra.mxu0 %v1916_v54 }
  0xc8   : > { %1168 = vmatpush2.bf16.msra.mxu1 %v1919_v55  ;;  %1126 = vmatprep.subr.bf16.mxu0 %v1924_v56 }
  0xc9   : > { %1169 = vmatprep.subr.bf16.mxu1 %v1927_v57 }
  0xcb   : > { %1127 = vmatpush2.bf16.msra.mxu0 %v1922_v58 }
  0xcc   : > { %1170 = vmatpush2.bf16.msra.mxu1 %v1925_v59  ;;  %1128 = vmatprep.subr.bf16.mxu0 %v1930_v60 }
  0xcd   : > { %1171 = vmatprep.subr.bf16.mxu1 %v1933_v61 }
  0xcf   : > { %1129 = vmatpush2.bf16.msra.mxu0 %v1928_v62 }
  0xd0   : > { %1172 = vmatpush2.bf16.msra.mxu1 %v1931_v63  ;;  %1130 = vmatprep.subr.bf16.mxu0 %v1936_v0 }
  0xd1   : > { %1173 = vmatprep.subr.bf16.mxu1 %v1939_v1 }
  0xd3   : > { %1131 = vmatpush2.bf16.msra.mxu0 %v1934_v2 }
  0xd4   : > { %1174 = vmatpush2.bf16.msra.mxu1 %v1937_v3  ;;  %1647 = vmatprep.subr.bf16.mxu0 %v1940_v6 }
  0xd6   : > { %1133 = vmatmul.mubr.bf16.vlgmr.msra.gmra.mxu0 %v2286_v4  ;;  %v1949_v4 = vld [vmem:[#allocation7 + $0x18] sm:$0xff]  }
  0xd7   : > { %1176 = vmatmul.mubr.bf16.vlgmr.msra.gmra.mxu1 %v2289_v5  ;;  %1648 = vmatpush3.bf16.msra.mxu0 %v1941_v7  ;;  %v1950_v5 = vld [vmem:[#allocation7 + $0x50] sm:$0xff]  }
  0xd8   : > { %1649 = vmatprep.subr.bf16.mxu0 %v1942_v8 }
  0xdb   : > { %1650 = vmatpush3.bf16.msra.mxu0 %v1943_v9 }
  0xdc   : > { %1651 = vmatprep.subr.bf16.mxu0 %v1944_v10 }
  0xdf   : > { %1652 = vmatpush3.bf16.msra.mxu0 %v1945_v11 }
  0xe0   : > { %1653 = vmatprep.subr.bf16.mxu0 %v1946_v12 }
  0xe3   : > { %1654 = vmatpush3.bf16.msra.mxu0 %v1947_v13 }
  0xe4   : > { %1655 = vmatprep.subr.bf16.mxu0 %v1948_v14 }
  0xe7   : > { %1656 = vmatpush3.bf16.msra.mxu0 %v1949_v4 }
  0xe8   : > { %1657 = vmatprep.subr.bf16.mxu0 %v1950_v5 }
  0xeb   : > { %1658 = vmatpush3.bf16.msra.mxu0 %v1951_v15 }
  0xec   : > { %1659 = vmatprep.subr.bf16.mxu0 %v1952_v16 }
  0xef   : > { %1660 = vmatpush3.bf16.msra.mxu0 %v1953_v17 }
  0xf0   : > { %1661 = vmatprep.subr.bf16.mxu0 %v1954_v18 }
  0xf3   : > { %1662 = vmatpush3.bf16.msra.mxu0 %v1955_v19 }
 0x156   : > { %v1048_v20 = vpop.f32.mrf.mxu0 }
 0x157   : > { %v1091_v21 = vpop.f32.mrf.mxu1 }
 0x158   : > { %v1050_v22 = vpop.f32.mrf.mxu0  ;;  %v1092_v40 = vadd.f32 %v1091_v21, %v1048_v20 }
 0x159   : > { %v1093_v23 = vpop.f32.mrf.mxu1 }
 0x15a   : > { %v1052_v24 = vpop.f32.mrf.mxu0  ;;  %v1094_v37 = vadd.f32 %v1093_v23, %v1050_v22  ;;  %v1186_v51 = vmul.f32 %v1092_v40, %v1092_v40 }
 0x15b   : > { %v1095_v25 = vpop.f32.mrf.mxu1 }
 0x15c   : > { %v1054_v26 = vpop.f32.mrf.mxu0  ;;  %v1096_v33 = vadd.f32 %v1095_v25, %v1052_v24  ;;  %v1187_v48 = vmul.f32 %v1094_v37, %v1094_v37 }
 0x15d   : > { %v1097_v27 = vpop.f32.mrf.mxu1 }
 0x15e   : > { %v1098_v38 = vadd.f32 %v1097_v27, %v1054_v26  ;;  %v1188_v46 = vmul.f32 %v1096_v33, %v1096_v33 }
 0x160   : > { %v1189_v49 = vmul.f32 %v1098_v38, %v1098_v38 }
 0x196   : > { %v1134_v28 = vpop.f32.mrf.mxu0 }
 0x197   : > { %v1177_v29 = vpop.f32.mrf.mxu1 }
 0x198   : > { %v1136_v30 = vpop.f32.mrf.mxu0  ;;  %v1178_v34 = vadd.f32 %v1177_v29, %v1134_v28 }
 0x199   : > { %v1179_v31 = vpop.f32.mrf.mxu1 }
 0x19a   : > { %v1180_v32 = vadd.f32 %v1179_v31, %v1136_v30  ;;  %v1138_v35 = vpop.f32.mrf.mxu0  ;;  %v1190_v47 = vmul.f32 %v1178_v34, %v1178_v34 }
 0x19b   : > { %v1181_v36 = vpop.f32.mrf.mxu1 }
 0x19c   : > { %v1182_v39 = vadd.f32 %v1181_v36, %v1138_v35  ;;  %v1140_v41 = vpop.f32.mrf.mxu0  ;;  %v1191_v43 = vmul.f32 %v1180_v32, %v1180_v32  ;;  %v1194_v55 = vadd.f32 %v1190_v47, %v1186_v51 }
 0x19d   : > { %v1183_v42 = vpop.f32.mrf.mxu1 }
 0x19e   : > { %v1192_v44 = vmul.f32 %v1182_v39, %v1182_v39  ;;  %v1184_v45 = vadd.f32 %v1183_v42, %v1140_v41  ;;  %v1195_v53 = vadd.f32 %v1191_v43, %v1187_v48 }
 0x1a0   : > { %v1193_v50 = vmul.f32 %v1184_v45, %v1184_v45  ;;  %v1196_v52 = vadd.f32 %v1192_v44, %v1188_v46 }
 0x1a2   : > { %v1197_v54 = vadd.f32 %v1193_v50, %v1189_v49  ;;  %v1198_v57 = vpack.c.bf16 %v1196_v52, %v1194_v55 }
 0x1a4   : > { %v1199_v56 = vpack.c.bf16 %v1197_v54, %v1195_v53 }
 0x1a6   : > { %1360 = vmatprep.mubr.bf16.mxu0 %v1199_v56 }
 0x1a7   : > { %1361 = vmatmul.mubr.bf16.vlgmr.msra.gmra.mxu0 %v1198_v57 }
 0x267   : > { %v1663_v58 = vpop.f32.mrf.mxu0 }
 0x269   : > { %v1664_v59 = vpop.f32.mrf.mxu0 }
 0x26a   : > { %v1665_v60 = vadd.f32 %v1664_v59, %v1663_v58 }
 0x26b   : > { %v1666_v61 = vpop.f32.mrf.mxu0 }
 0x26c   : > { %1369 = vst [vmem:[%s218_s20] sm:$0xff] %v1665_v60 }
 0x26d   : > { %v1667_v62 = vpop.f32.mrf.mxu0 }
 0x26e   : > { %v1668_v63 = vadd.f32 %v1667_v62, %v1666_v61 }
 0x270   : > { %1370 = vst [vmem:[%s218_s20 + $0x8] sm:$0xff] %v1668_v63 }
 0x271   : > { %2049 = shalt.err (!%p2046_p3)
}
 0x272   : > { %s2050_s25 = scalar_lea.hbm %s2302_s5, 256  ;;  %s2054_s8 = scalar_lea.hbm %s2348_s3, 512 }
 0x273   : > { %p2051_p11 = scmp.ne.s32.totalorder %s2302_s5, %s2050_s25  ;;  %p2055_p4 = scmp.lt.s32.totalorder %s2302_s5, %s2348_s3 }
 0x274   : > { %p2056_p6 = scmp.lt.s32.totalorder %s2054_s8, %s2050_s25 }
 0x275   : > { %p2052_p9 = pnand %p2051_p11, %p2363_p2 }
 0x276   : > { %p2057_p8 = por %p2056_p6, %p2055_p4 }
 0x277   : > { %p2053_p1 = pneg %p2052_p9 }
 0x279   : > { %p2058_p10 = pnand %p2057_p8, %p2053_p1 }
 0x27b   : > { %2061 = shalt.err (!%p2058_p10)
}
 0x27c   : > { %s2114_s18 = smov 128   ;;  %s2115_s20 = smov 8  }
 0x27d   : > { %1679 = dma.vmem_to_hbm [thread:$0]  (%p2363_p2), %s2297_s27, 256, %s2302_s5, %s1372_s6, %s2114_s18, %s2114_s18, %s2115_s20  }
 0x27e PF: > { %s1400_s28 = sand.u32 1, %s2092_s12   ;;  %p2364_p7 = scmp.ne.s32.totalorder %s2354_s19, 0 }
 0x27f   : > { %p2365_p12 = scmp.ge.s32.totalorder %s2104_s15, 2  ;;  %s1401_s29 = scalar_lea.sflag [#allocation4], %s1400_s28 }
 0x281   : > { %p1693_p13 = pnand %p2365_p12, %p2364_p7 }
 0x283   : > { %p1694_p0 = pneg %p1693_p13 }
 0x285   : > { %2087 = dma.done.wait (%p1694_p0), %s1401_s29, 256  }
 0x286   : > { %2089 = vsyncadd (%p1694_p0), %s1401_s29, 4294967040  ;;  %p17_p5 = scmp.ge.s32.totalorder %s2211_s9, 4   ;;  %s2366_s12 = smov %s2096_s13 }
 0x287   : > { %s2367_s13 = smov %s2100_s14  ;;  %s2368_s14 = smov %s2220_s17 }
 0x288   : > { %s2369_s15 = smov %s2211_s9  ;;  %19 = sbr.rel (!%p17_p5) target bundleno = 6 (0x6), region = 85 }
 0x28d   :  { %1406 = vsyncpa [#allocation3], 1 }
 0x28e   :  { %1408 = vsyncpa [#allocation3 + $0x1], 1 }
 0x28f   :  { %1409 = vsyncpa [#allocation6], 1 }
 0x290   :  { %1410 = vsyncpa [#allocation4], 1 }
 0x291   :  { %1412 = vsyncpa [#allocation4 + $0x1], 1 }

</bundles_post_ra>
